<compile_context>
chip_gen: v7x
topology: tpu7x:2x2x1
jax: 0.10.0
libtpu: 0.0.40
codegen_flags: <defaults>
</compile_context>

<pallas_src>
import functools
import math

import jax
import jax.numpy as jnp
from jax.experimental import pallas as pl
from jax.experimental.pallas import tpu as pltpu

EPS = 1e-5


def _mlscm_kernel(x_ref, w_ref, b_ref, gb_ref, o_ref, *, seq_len):
    """One grid step over R = bblk*seq_len flattened (batch, position) rows.

    x_ref:  (R, H)        channels-last activations for bblk whole sequences
    w_ref:  (2, 3H, 4H)   per-stage fused conv weights, taps K-concatenated
    b_ref:  (2, 1, 4H)    per-stage fused conv biases
    gb_ref: (2, H)        LayerNorm gamma (row 0) / beta (row 1)
    o_ref:  (R, H)
    """
    x = x_ref[...]                                    # (R, H)
    R, H = x.shape
    gb = gb_ref[...]                                  # read LN affine once
    gamma = gb[0:1, :]
    beta = gb[1:2, :]

    # fstate = LayerNorm(tanh(vec)) over the hidden (channel) axis.
    t = jnp.tanh(x)
    mu = jnp.mean(t, axis=-1, keepdims=True)
    var = jnp.mean(jnp.square(t - mu), axis=-1, keepdims=True)
    fs = (t - mu) * jax.lax.rsqrt(var + EPS) * gamma + beta

    # Sequence-boundary masks (rows are bblk sequences of seq_len positions
    # flattened together; the k=3 convs must not leak across sequences).
    pos = jax.lax.broadcasted_iota(jnp.int32, (R, 1), 0) % seq_len
    not_first = pos != 0                              # zero x[l-1] at l == 0
    not_last = pos != (seq_len - 1)                   # zero x[l+1] at l == L-1

    def gates(v, stage):
        """gate1 * gate2 for one stage, all 4 convs fused into one MXU dot.

        Gate columns of y are laid out [sig-A | sig-B | relu-C | relu-D];
        returns (sig(A)*relu(C)) * (sig(B)*relu(D)), shape (R, H).
        """
        # Shifted taps via the XLU (roll) + boundary select; shared by all 4
        # convs of the stage.  roll(+1): row r sees row r-1; roll(R-1): r+1.
        xm1 = jnp.where(not_first, pltpu.roll(v, 1, axis=0), 0.0)
        xp1 = jnp.where(not_last, pltpu.roll(v, R - 1, axis=0), 0.0)
        x3 = jnp.concatenate([xm1, v, xp1], axis=-1)            # (R, 3H)
        y = jnp.dot(x3, w_ref[stage], preferred_element_type=jnp.float32)
        y = y + b_ref[stage]                                    # (R, 4H)
        a = jax.nn.sigmoid(y[:, : 2 * H])       # [sig(A)  | sig(B) ]
        r = jnp.maximum(y[:, 2 * H :], 0.0)     # [relu(C) | relu(D)]
        p = a * r                               # [sig(A)*relu(C) | sig(B)*relu(D)]
        return p[:, :H] * p[:, H:]              # (R, H)

    # Stage 1: gxf = sig(gxfx)*relu(gxfh); gcf = sig(gcfx)*relu(gcfh)
    fs = jnp.maximum(fs * gates(fs, 0), 0.0)
    # Stage 2: gcx = sig(gxdx)*relu(gxfh); gcd = sig(gcdx)*relu(gcfh)
    fs = jnp.maximum(fs + gates(fs, 1), 0.0)

    # TODO(synk): nn.Dropout(0.2) is identity in eval mode; training-mode dropout not implemented.
    o_ref[...] = fs + x


def _pack_params(weights, biases):
    """Pack the 8 Conv1d(k=3) parameter sets into two per-stage fused blocks.

    weights: (8, 3, H, H) with weights[i, k, ci, co] == torch_W_i[co, ci, k]
    biases:  (8, 1, H)
    Stack order: 0=gxfx 1=gcfx 2=gxfh 3=gcfh 4=gxdx 5=gxdh 6=gcdx 7=gcdh.
    Unused gxdh/gcdh (5, 7) are never shipped to the kernel.

    Returns:
      wf: (2, 3H, 4H) — row block [k*H:(k+1)*H] is tap k (l-1, l, l+1); column
          block [g*H:(g+1)*H] is gate g in order [sig-A, sig-B, relu-C, relu-D].
      bf: (2, 1, 4H)
      stage 0 gates: (gxfx, gcfx, gxfh, gcfh); stage 1: (gxdx, gcdx, gxfh, gcfh)
    """
    H = weights.shape[-1]
    wf, bf = [], []
    for idx in ((0, 1, 2, 3), (4, 6, 2, 3)):
        sel = jnp.array(idx)
        wg = weights[sel]                            # (4, 3, H, H)  [g, k, ci, co]
        wg = jnp.transpose(wg, (1, 2, 0, 3))         # (k, ci, g, co)
        wf.append(wg.reshape(3 * H, 4 * H))
        bf.append(biases[sel].reshape(1, 4 * H))
    return jnp.stack(wf), jnp.stack(bf)


def _pick_block_batch(B, L):
    """Sequences folded per grid step: big-M matmuls, >=2 parallel steps."""
    rows_target = 1024                      # M rows per step: fills MXU, small VMEM
    m = 8 // math.gcd(L, 8)                 # keep (bblk * L) % 8 == 0 (sublane tile)
    bblk = max(1, min(B, rows_target // max(L, 1)))
    bblk = max(m, (bblk // m) * m)
    if pl.cdiv(B, bblk) < 2 and B > 1:      # keep both v7x TCs / megacore busy
        half = max(m, (((B + 1) // 2) // m) * m)
        if pl.cdiv(B, half) >= 2:
            bblk = half
    return bblk


def mlscm_forward(vec_ncl, weights, biases, gamma, beta):
    """vec_ncl: (B, H, L) PyTorch Conv1d-style input; returns (B, H, L)."""
    x = jnp.transpose(vec_ncl, (0, 2, 1)).astype(jnp.float32)   # (B, L, H)
    B, L, H = x.shape

    wf, bf = _pack_params(weights.astype(jnp.float32), biases.astype(jnp.float32))
    gb = jnp.concatenate(
        [gamma.reshape(1, H).astype(jnp.float32),
         beta.reshape(1, H).astype(jnp.float32)], axis=0)        # (2, H)

    bblk = _pick_block_batch(B, L)
    steps = pl.cdiv(B, bblk)
    Bp = steps * bblk
    if Bp != B:                               # zero-pad batch so blocks tile exactly
        x = jnp.concatenate([x, jnp.zeros((Bp - B, L, H), x.dtype)], axis=0)
    xf = x.reshape(Bp * L, H)                 # row-major: free reshape
    R = bblk * L                              # rows (matmul M dim) per grid step

    # VMEM budget from the actual slab size (double-buffered in/out, fused
    # weights, in-kernel temporaries), kept well under v7x's 64 MiB ceiling.
    slab = R * 128 * 4                        # one (R, <=128-lane) f32 slab
    vmem_bytes = int(min(32 * 1024 * 1024, max(8 * 1024 * 1024, 32 * slab)))

    out = pl.pallas_call(
        functools.partial(_mlscm_kernel, seq_len=L),
        out_shape=jax.ShapeDtypeStruct((Bp * L, H), jnp.float32),
        grid_spec=pltpu.PrefetchScalarGridSpec(
            num_scalar_prefetch=0,
            grid=(steps,),
            in_specs=[
                pl.BlockSpec((R, H), lambda i: (i, 0)),                # activations
                pl.BlockSpec((2, 3 * H, 4 * H), lambda i: (0, 0, 0)),  # fused W (grid-invariant)
                pl.BlockSpec((2, 1, 4 * H), lambda i: (0, 0, 0)),      # fused b
                pl.BlockSpec((2, H), lambda i: (0, 0)),                # LN gamma/beta
            ],
            out_specs=pl.BlockSpec((R, H), lambda i: (i, 0)),
        ),
        compiler_params=pltpu.CompilerParams(
            dimension_semantics=("parallel",),
            vmem_limit_bytes=vmem_bytes,
        ),
    )(xf, wf, bf, gb)

    out = out.reshape(Bp, L, H)[:B]
    return jnp.transpose(out, (0, 2, 1))


def ref_forward(vec_ncl, weights, biases, gamma, beta):
    """Pure-JAX reference of the same forward pass (for verification)."""
    x = jnp.transpose(vec_ncl, (0, 2, 1)).astype(jnp.float32)   # (B, L, H)

    def conv(inp, i):
        w, b = weights[i], biases[i]
        zero = jnp.zeros_like(inp[:, :1])
        xm1 = jnp.concatenate([zero, inp[:, :-1]], axis=1)
        xp1 = jnp.concatenate([inp[:, 1:], zero], axis=1)
        return xm1 @ w[0] + inp @ w[1] + xp1 @ w[2] + b

    sig = jax.nn.sigmoid
    relu = lambda v: jnp.maximum(v, 0.0)
    t = jnp.tanh(x)
    mu = t.mean(-1, keepdims=True)
    var = jnp.square(t - mu).mean(-1, keepdims=True)
    fs = (t - mu) * jax.lax.rsqrt(var + EPS) * gamma + beta
    gxf = sig(conv(fs, 0)) * relu(conv(fs, 2))
    gcf = sig(conv(fs, 1)) * relu(conv(fs, 3))
    fs = relu(fs * gxf * gcf)
    gcx = sig(conv(fs, 4)) * relu(conv(fs, 2))
    gcd = sig(conv(fs, 6)) * relu(conv(fs, 3))
    fs = relu(fs + gcd * gcx)
    return jnp.transpose(fs + x, (0, 2, 1))


if __name__ == "__main__":
    root = jax.random.PRNGKey(0)

    def make_inputs(key, B, H, L):
        k_vec, k_w, k_b, k_g, k_be = jax.random.split(key, 5)
        vec = jax.random.normal(k_vec, (B, H, L), jnp.float32)            # NCL input
        weights = jax.random.normal(k_w, (8, 3, H, H), jnp.float32) / jnp.sqrt(3.0 * H)
        biases = jax.random.normal(k_b, (8, 1, H), jnp.float32) * 0.01
        gamma = 1.0 + 0.1 * jax.random.normal(k_g, (1, H), jnp.float32)
        beta = 0.1 * jax.random.normal(k_be, (1, H), jnp.float32)
        return vec, weights, biases, gamma, beta

    # (B, H=hidden_dim, L): small primary config plus folded / padded-batch configs.
    for B, H, L in ((2, 32, 16), (8, 32, 16), (5, 32, 16)):
        root, sub = jax.random.split(root)
        vec, weights, biases, gamma, beta = make_inputs(sub, B, H, L)
        out = jax.block_until_ready(mlscm_forward(vec, weights, biases, gamma, beta))
        assert out.shape == vec.shape
        ref = ref_forward(vec, weights, biases, gamma, beta)
        assert jnp.allclose(out, ref, atol=1e-4, rtol=1e-4), (
            f"mismatch vs JAX reference at B={B}, L={L}")

    print("KERNEL_OK")
</pallas_src>

<mosaic_0001>
module attributes {stable_mosaic.version = 11 : i64} {
  func.func @_mlscm_kernel(%arg0: i32, %arg1: memref<16x32xf32, #tpu.memory_space<vmem>>, %arg2: memref<2x96x128xf32, #tpu.memory_space<vmem>>, %arg3: memref<2x1x128xf32, #tpu.memory_space<vmem>>, %arg4: memref<2x32xf32, #tpu.memory_space<vmem>>, %arg5: memref<16x32xf32, #tpu.memory_space<vmem>>) attributes {dimension_semantics = [#tpu.dimension_semantics<parallel>], iteration_bounds = array<i64: 2>, scalar_prefetch = 0 : i64, scratch_operands = 0 : i64, tpu.core_type = #tpu.core_type<tc>, window_params = [{transform_indices = @transform_0, window_bounds = array<i64: 16, 32>}, {pipeline_mode = #tpu.pipeline_mode<synchronous>, transform_indices = @transform_1, window_bounds = array<i64: 2, 96, 128>}, {pipeline_mode = #tpu.pipeline_mode<synchronous>, transform_indices = @transform_2, window_bounds = array<i64: 2, 1, 128>}, {pipeline_mode = #tpu.pipeline_mode<synchronous>, transform_indices = @transform_3, window_bounds = array<i64: 2, 32>}, {transform_indices = @transform_4, window_bounds = array<i64: 16, 32>}]} {
    %c0 = arith.constant 0 : index
    %c0_0 = arith.constant 0 : index
    %0 = vector.load %arg1[%c0, %c0_0] : memref<16x32xf32, #tpu.memory_space<vmem>>, vector<16x32xf32>
    %c0_1 = arith.constant 0 : index
    %c0_2 = arith.constant 0 : index
    %1 = vector.load %arg4[%c0_1, %c0_2] : memref<2x32xf32, #tpu.memory_space<vmem>>, vector<2x32xf32>
    %2 = vector.extract_strided_slice %1 {offsets = [0, 0], sizes = [1, 32], strides = [1, 1]} : vector<2x32xf32> to vector<1x32xf32>
    %3 = vector.extract_strided_slice %1 {offsets = [1, 0], sizes = [1, 32], strides = [1, 1]} : vector<2x32xf32> to vector<1x32xf32>
    %4 = math.tanh %0 : vector<16x32xf32>
    %cst = arith.constant dense<0.000000e+00> : vector<16xf32>
    %5 = vector.multi_reduction <add>, %4, %cst [1] : vector<16x32xf32> to vector<16xf32>
    %6 = vector.shape_cast %5 : vector<16xf32> to vector<16x1xf32>
    %cst_3 = arith.constant 3.200000e+01 : f32
    %7 = vector.broadcast %cst_3 : f32 to vector<16x1xf32>
    %8 = arith.divf %6, %7 : vector<16x1xf32>
    %9 = vector.broadcast %8 : vector<16x1xf32> to vector<16x32xf32>
    %10 = arith.subf %4, %9 : vector<16x32xf32>
    %11 = arith.mulf %10, %10 : vector<16x32xf32>
    %cst_4 = arith.constant dense<0.000000e+00> : vector<16xf32>
    %12 = vector.multi_reduction <add>, %11, %cst_4 [1] : vector<16x32xf32> to vector<16xf32>
    %13 = vector.shape_cast %12 : vector<16xf32> to vector<16x1xf32>
    %cst_5 = arith.constant 3.200000e+01 : f32
    %14 = vector.broadcast %cst_5 : f32 to vector<16x1xf32>
    %15 = arith.divf %13, %14 : vector<16x1xf32>
    %16 = vector.broadcast %8 : vector<16x1xf32> to vector<16x32xf32>
    %17 = arith.subf %4, %16 : vector<16x32xf32>
    %cst_6 = arith.constant 9.99999974E-6 : f32
    %18 = vector.broadcast %cst_6 : f32 to vector<16x1xf32>
    %19 = arith.addf %15, %18 : vector<16x1xf32>
    %20 = math.rsqrt %19 : vector<16x1xf32>
    %21 = vector.broadcast %20 : vector<16x1xf32> to vector<16x32xf32>
    %22 = arith.mulf %17, %21 : vector<16x32xf32>
    %23 = vector.broadcast %2 : vector<1x32xf32> to vector<16x32xf32>
    %24 = arith.mulf %22, %23 : vector<16x32xf32>
    %25 = vector.broadcast %3 : vector<1x32xf32> to vector<16x32xf32>
    %26 = arith.addf %24, %25 : vector<16x32xf32>
    %27 = tpu.iota {dimensions = array<i32: 0>} : vector<16x1xi32>
    %c16_i32 = arith.constant 16 : i32
    %c0_i32 = arith.constant 0 : i32
    %28 = arith.cmpi eq, %c16_i32, %c0_i32 : i32
    %c1_i32 = arith.constant 1 : i32
    %29 = arith.select %28, %c1_i32, %c16_i32 : i32
    %30 = vector.broadcast %29 : i32 to vector<16x1xi32>
    %31 = arith.remsi %27, %30 : vector<16x1xi32>
    %c0_i32_7 = arith.constant 0 : i32
    %32 = vector.broadcast %c0_i32_7 : i32 to vector<16x1xi32>
    %33 = arith.cmpi ne, %31, %32 : vector<16x1xi32>
    %c0_i32_8 = arith.constant 0 : i32
    %34 = vector.broadcast %c0_i32_8 : i32 to vector<16x1xi32>
    %35 = arith.cmpi slt, %31, %34 : vector<16x1xi32>
    %c0_i32_9 = arith.constant 0 : i32
    %36 = arith.cmpi slt, %29, %c0_i32_9 : i32
    %37 = vector.broadcast %36 : i1 to vector<16x1xi1>
    %38 = vector.broadcast %37 : vector<16x1xi1> to vector<16x1xi1>
    %39 = arith.xori %35, %38 : vector<16x1xi1>
    %40 = arith.andi %39, %33 : vector<16x1xi1>
    %41 = vector.broadcast %29 : i32 to vector<16x1xi32>
    %42 = arith.addi %31, %41 : vector<16x1xi32>
    %43 = arith.select %40, %42, %31 : vector<16x1xi1>, vector<16x1xi32>
    %c0_i32_10 = arith.constant 0 : i32
    %44 = vector.broadcast %c0_i32_10 : i32 to vector<16x1xi32>
    %45 = arith.cmpi ne, %43, %44 : vector<16x1xi32>
    %c15_i32 = arith.constant 15 : i32
    %46 = vector.broadcast %c15_i32 : i32 to vector<16x1xi32>
    %47 = arith.cmpi ne, %43, %46 : vector<16x1xi32>
    %c1_i32_11 = arith.constant 1 : i32
    %48 = tpu.dynamic_rotate %26 by %c1_i32_11 dim 0 : vector<16x32xf32>, i32 -> vector<16x32xf32>
    %cst_12 = arith.constant 0.000000e+00 : f32
    %49 = vector.shape_cast %45 : vector<16x1xi1> to vector<16x1xi1>
    %50 = vector.broadcast %49 : vector<16x1xi1> to vector<16x32xi1>
    %51 = vector.broadcast %cst_12 : f32 to vector<16x32xf32>
    %52 = arith.select %50, %48, %51 : vector<16x32xi1>, vector<16x32xf32>
    %c15_i32_13 = arith.constant 15 : i32
    %53 = tpu.dynamic_rotate %26 by %c15_i32_13 dim 0 : vector<16x32xf32>, i32 -> vector<16x32xf32>
    %cst_14 = arith.constant 0.000000e+00 : f32
    %54 = vector.shape_cast %47 : vector<16x1xi1> to vector<16x1xi1>
    %55 = vector.broadcast %54 : vector<16x1xi1> to vector<16x32xi1>
    %56 = vector.broadcast %cst_14 : f32 to vector<16x32xf32>
    %57 = arith.select %55, %53, %56 : vector<16x32xi1>, vector<16x32xf32>
    %58 = tpu.concatenate %52, %26, %57 in 1 : vector<16x32xf32>, vector<16x32xf32>, vector<16x32xf32> -> vector<16x96xf32>
    %c0_15 = arith.constant 0 : index
    %c0_16 = arith.constant 0 : index
    %c0_17 = arith.constant 0 : index
    %59 = vector.load %arg2[%c0_15, %c0_16, %c0_17] : memref<2x96x128xf32, #tpu.memory_space<vmem>>, vector<1x96x128xf32>
    %60 = vector.shape_cast %59 : vector<1x96x128xf32> to vector<96x128xf32>
    %cst_18 = arith.constant dense<0.000000e+00> : vector<16x128xf32>
    %61 = tpu.matmul %58, %60, %cst_18 {dimension_numbers = #tpu.dot_dimension_numbers<[1], [0], [0], [1], [0, 0, 1, 1], [], []>} : vector<16x96xf32>, vector<96x128xf32>, vector<16x128xf32> -> vector<16x128xf32>
    %c0_19 = arith.constant 0 : index
    %c0_20 = arith.constant 0 : index
    %c0_21 = arith.constant 0 : index
    %62 = vector.load %arg3[%c0_19, %c0_20, %c0_21] : memref<2x1x128xf32, #tpu.memory_space<vmem>>, vector<1x1x128xf32>
    %63 = vector.shape_cast %62 : vector<1x1x128xf32> to vector<1x128xf32>
    %64 = vector.broadcast %63 : vector<1x128xf32> to vector<16x128xf32>
    %65 = arith.addf %61, %64 : vector<16x128xf32>
    %66 = vector.extract_strided_slice %65 {offsets = [0, 0], sizes = [16, 64], strides = [1, 1]} : vector<16x128xf32> to vector<16x64xf32>
    %67 = arith.negf %66 : vector<16x64xf32>
    %68 = math.exp %67 : vector<16x64xf32>
    %cst_22 = arith.constant 1.000000e+00 : f32
    %69 = vector.broadcast %cst_22 : f32 to vector<16x64xf32>
    %70 = arith.addf %69, %68 : vector<16x64xf32>
    %71 = arith.divf %69, %70 : vector<16x64xf32>
    %72 = vector.extract_strided_slice %65 {offsets = [0, 64], sizes = [16, 64], strides = [1, 1]} : vector<16x128xf32> to vector<16x64xf32>
    %cst_23 = arith.constant 0.000000e+00 : f32
    %73 = vector.broadcast %cst_23 : f32 to vector<16x64xf32>
    %74 = arith.maximumf %72, %73 : vector<16x64xf32>
    %75 = arith.mulf %71, %74 : vector<16x64xf32>
    %76 = vector.extract_strided_slice %75 {offsets = [0, 0], sizes = [16, 32], strides = [1, 1]} : vector<16x64xf32> to vector<16x32xf32>
    %77 = vector.extract_strided_slice %75 {offsets = [0, 32], sizes = [16, 32], strides = [1, 1]} : vector<16x64xf32> to vector<16x32xf32>
    %78 = arith.mulf %76, %77 : vector<16x32xf32>
    %79 = arith.mulf %26, %78 : vector<16x32xf32>
    %cst_24 = arith.constant 0.000000e+00 : f32
    %80 = vector.broadcast %cst_24 : f32 to vector<16x32xf32>
    %81 = arith.maximumf %79, %80 : vector<16x32xf32>
    %c1_i32_25 = arith.constant 1 : i32
    %82 = tpu.dynamic_rotate %81 by %c1_i32_25 dim 0 : vector<16x32xf32>, i32 -> vector<16x32xf32>
    %cst_26 = arith.constant 0.000000e+00 : f32
    %83 = vector.shape_cast %45 : vector<16x1xi1> to vector<16x1xi1>
    %84 = vector.broadcast %83 : vector<16x1xi1> to vector<16x32xi1>
    %85 = vector.broadcast %cst_26 : f32 to vector<16x32xf32>
    %86 = arith.select %84, %82, %85 : vector<16x32xi1>, vector<16x32xf32>
    %c15_i32_27 = arith.constant 15 : i32
    %87 = tpu.dynamic_rotate %81 by %c15_i32_27 dim 0 : vector<16x32xf32>, i32 -> vector<16x32xf32>
    %cst_28 = arith.constant 0.000000e+00 : f32
    %88 = vector.shape_cast %47 : vector<16x1xi1> to vector<16x1xi1>
    %89 = vector.broadcast %88 : vector<16x1xi1> to vector<16x32xi1>
    %90 = vector.broadcast %cst_28 : f32 to vector<16x32xf32>
    %91 = arith.select %89, %87, %90 : vector<16x32xi1>, vector<16x32xf32>
    %92 = tpu.concatenate %86, %81, %91 in 1 : vector<16x32xf32>, vector<16x32xf32>, vector<16x32xf32> -> vector<16x96xf32>
    %c1 = arith.constant 1 : index
    %c0_29 = arith.constant 0 : index
    %c0_30 = arith.constant 0 : index
    %93 = vector.load %arg2[%c1, %c0_29, %c0_30] : memref<2x96x128xf32, #tpu.memory_space<vmem>>, vector<1x96x128xf32>
    %94 = vector.shape_cast %93 : vector<1x96x128xf32> to vector<96x128xf32>
    %cst_31 = arith.constant dense<0.000000e+00> : vector<16x128xf32>
    %95 = tpu.matmul %92, %94, %cst_31 {dimension_numbers = #tpu.dot_dimension_numbers<[1], [0], [0], [1], [0, 0, 1, 1], [], []>} : vector<16x96xf32>, vector<96x128xf32>, vector<16x128xf32> -> vector<16x128xf32>
    %c1_32 = arith.constant 1 : index
    %c0_33 = arith.constant 0 : index
    %c0_34 = arith.constant 0 : index
    %96 = vector.load %arg3[%c1_32, %c0_33, %c0_34] : memref<2x1x128xf32, #tpu.memory_space<vmem>>, vector<1x1x128xf32>
    %97 = vector.shape_cast %96 : vector<1x1x128xf32> to vector<1x128xf32>
    %98 = vector.broadcast %97 : vector<1x128xf32> to vector<16x128xf32>
    %99 = arith.addf %95, %98 : vector<16x128xf32>
    %100 = vector.extract_strided_slice %99 {offsets = [0, 0], sizes = [16, 64], strides = [1, 1]} : vector<16x128xf32> to vector<16x64xf32>
    %101 = arith.negf %100 : vector<16x64xf32>
    %102 = math.exp %101 : vector<16x64xf32>
    %cst_35 = arith.constant 1.000000e+00 : f32
    %103 = vector.broadcast %cst_35 : f32 to vector<16x64xf32>
    %104 = arith.addf %103, %102 : vector<16x64xf32>
    %105 = arith.divf %103, %104 : vector<16x64xf32>
    %106 = vector.extract_strided_slice %99 {offsets = [0, 64], sizes = [16, 64], strides = [1, 1]} : vector<16x128xf32> to vector<16x64xf32>
    %cst_36 = arith.constant 0.000000e+00 : f32
    %107 = vector.broadcast %cst_36 : f32 to vector<16x64xf32>
    %108 = arith.maximumf %106, %107 : vector<16x64xf32>
    %109 = arith.mulf %105, %108 : vector<16x64xf32>
    %110 = vector.extract_strided_slice %109 {offsets = [0, 0], sizes = [16, 32], strides = [1, 1]} : vector<16x64xf32> to vector<16x32xf32>
    %111 = vector.extract_strided_slice %109 {offsets = [0, 32], sizes = [16, 32], strides = [1, 1]} : vector<16x64xf32> to vector<16x32xf32>
    %112 = arith.mulf %110, %111 : vector<16x32xf32>
    %113 = arith.addf %81, %112 : vector<16x32xf32>
    %cst_37 = arith.constant 0.000000e+00 : f32
    %114 = vector.broadcast %cst_37 : f32 to vector<16x32xf32>
    %115 = arith.maximumf %113, %114 : vector<16x32xf32>
    %116 = arith.addf %115, %0 : vector<16x32xf32>
    %c0_38 = arith.constant 0 : index
    %c0_39 = arith.constant 0 : index
    %117 = vector.load %arg5[%c0_38, %c0_39] : memref<16x32xf32, #tpu.memory_space<vmem>>, vector<16x32xf32>
    tpu.vector_store %arg5[%c0_38, %c0_39], %116 {strides = array<i32>} : memref<16x32xf32, #tpu.memory_space<vmem>>, vector<16x32xf32>,
    return
  }
  func.func @transform_0(%arg0: i32) -> (i32, i32) {
    %c0_i32 = arith.constant 0 : i32
    %c0_i32_0 = arith.constant 0 : i32
    return %arg0, %c0_i32 : i32, i32
  }
  func.func @transform_1(%arg0: i32) -> (i32, i32, i32) {
    %c0_i32 = arith.constant 0 : i32
    %c0_i32_0 = arith.constant 0 : i32
    %c0_i32_1 = arith.constant 0 : i32
    %c0_i32_2 = arith.constant 0 : i32
    return %c0_i32, %c0_i32_0, %c0_i32_1 : i32, i32, i32
  }
  func.func @transform_2(%arg0: i32) -> (i32, i32, i32) {
    %c0_i32 = arith.constant 0 : i32
    %c0_i32_0 = arith.constant 0 : i32
    %c0_i32_1 = arith.constant 0 : i32
    %c0_i32_2 = arith.constant 0 : i32
    return %c0_i32, %c0_i32_0, %c0_i32_1 : i32, i32, i32
  }
  func.func @transform_3(%arg0: i32) -> (i32, i32) {
    %c0_i32 = arith.constant 0 : i32
    %c0_i32_0 = arith.constant 0 : i32
    %c0_i32_1 = arith.constant 0 : i32
    return %c0_i32, %c0_i32_0 : i32, i32
  }
  func.func @transform_4(%arg0: i32) -> (i32, i32) {
    %c0_i32 = arith.constant 0 : i32
    %c0_i32_0 = arith.constant 0 : i32
    return %arg0, %c0_i32 : i32, i32
  }
}

</mosaic_0001>

<bundles_post_ra>
// kernel: tpu_custom_call.1
= control target key start
LH: loop header
LB: loop body
LE: loop exit
PB: predicated region body
PF: predicated region fallthrough
CT: control target
= control target key end

     0   :  { %9 = vsyncpa [#allocation3], 0  ;;  %s1490_s0 = inlined_call_operand.hbm [shape: f32[32,32], index: 0, kind: input, shape index: {}]   ;;  %s1491_s1 = inlined_call_operand.hbm [shape: f32[2,96,128], index: 1, kind: input, shape index: {}]   ;;  %s1492_s2 = inlined_call_operand.vmem [shape: f32[2,1,128], index: 2, kind: input, shape index: {}]   ;;  %s1493_s3 = inlined_call_operand.vmem [shape: f32[2,32], index: 3, kind: input, shape index: {}]   ;;  %s1494_s4 = inlined_call_operand.hbm [shape: f32[32,32], index: 4, kind: output, shape index: {}]  }
   0x1   :  { %11 = vsyncpa [#allocation3 + $0x1], 0 }
   0x2   :  { %12 = vsyncpa [#allocation6], 0 }
   0x3   :  { %13 = vsyncpa [#allocation4], 0 }
   0x4   :  { %15 = vsyncpa [#allocation4 + $0x1], 0  ;;  %s1176_s15 = smov 0   ;;  %s1178_s16 = smov 0  }
   0x5   :  { %s1180_s17 = smov 0   ;;  %s1182_s18 = smov 0  }
   0x6 LB: > { %s1197_s19 = sadd.s32 4294967295, %s1139_s18   ;;  %s764_s20 = sadd.s32 4294967294, %s1139_s18   ;;  %s1139_s18 = sphi %s1182_s18, %s1518_s18   ;;  %s1135_s17 = sphi %s1180_s17, %s1517_s17   ;;  %s1131_s16 = sphi %s1178_s16, %s1516_s16   ;;  %s1127_s15 = sphi %s1176_s15, %s1515_s15  }
   0x7   : > { %p41_p0 = scmp.ne.s32.totalorder %s1131_s16, %s1127_s15  ;;  %p1495_p1 = scmp.eq.s32.totalorder %s1197_s19, 0 }
   0x8   : > { %p134_p3 = scmp.eq.s32.totalorder %s764_s20, 1  ;;  %p765_p5 = scmp.ge.s32.totalorder %s1139_s18, 1 }
   0x9   : > { %p1206_p4 = por %p1495_p1, %p41_p0  ;;  %p141_p7 = scmp.lt.s32.totalorder %s1139_s18, 3 }
   0xa   : > { %p1211_p6 = por %p134_p3, %p41_p0  ;;  %s1141_s24 = smov [#allocation5]  }
   0xb   : > { %s1498_s21 = scalar_select %p1206_p4, 1, 0 }
   0xc   : > { %s1499_s22 = scalar_select %p1211_p6, 1, 0 }
   0xd   : > { %p1216_p8 = pnand %p765_p5, %p141_p7  ;;  %s153_s25 = sshll.u32 %s1141_s24, 4  ;;  %s1220_s25 = int_to_ptr.vmem [resolvable:$true] %s153_s25 }
   0xe   : > { %s1232_s27 = sadd.s32 1, %s1139_s18   ;;  %s28_s28 = sadd.s32 1, %s1135_s17 }
   0xf   : > { %s1500_s23 = scalar_select %p1216_p8, 1, 0 }
  0x10   : > { %p931_p9 = pneg %p1216_p8  ;;  %s25_s29 = ssub.s32 %s1139_s18, %s1232_s27 }
  0x11   : > { %s1011_s6 = scalar_lea.hbm %s1491_s1, 3072 }
  0x12   : > { %p1227_p11 = pnand %p931_p9, %p1495_p1  ;;  %p1012_p12 = scmp.ne.s32.totalorder %s1491_s1, %s1011_s6 }
  0x13   : > { %p1018_p5 = scmp.lt.u32.totalorder %s1011_s6, %s1491_s1 }
  0x14   : > { %p1013_p13 = pneg %p1227_p11 }
  0x16   : > { %p1014_p0 = pnand %p1013_p13, %p1012_p12 }
  0x18   : > { %p1015_p3 = pneg %p1014_p0 }
  0x1a   : > { %p1020_p7 = pnand %p1018_p5, %p1015_p3 }
  0x1c   : > { %1023 = shalt.err (!%p1020_p7)
}
  0x1d   : > { %s1024_s11 = scalar_lea.vmem %s1220_s25, 3072  ;;  %p1032_p2 = scmp.lt.s32.totalorder %s1220_s25, %s1220_s25 }
  0x1e   : > { %p1025_p9 = scmp.ne.s32.totalorder %s1220_s25, %s1024_s11  ;;  %p1033_p6 = scmp.lt.s32.totalorder %s1024_s11, %s1024_s11 }
  0x20   : > { %p1027_p10 = pnand %p1025_p9, %p1013_p13  ;;  %p1034_p4 = por %p1033_p6, %p1032_p2 }
  0x22   : > { %p1028_p1 = pneg %p1027_p10 }
  0x24   : > { %p1035_p8 = pnand %p1034_p4, %p1028_p1 }
  0x26   : > { %1038 = shalt.err (!%p1035_p8)
}
  0x27   : > { %s1142_s12 = smov 128   ;;  %s1143_s13 = smov 8  }
  0x28   : > { %934 = dma.hbm_to_vmem [thread:$0]  (!%p1227_p11), %s1491_s1, 3072, %s1220_s25, [#allocation6], %s1142_s12, %s1142_s12, %s1143_s13  }
  0x29   : > { %p26_p1 = scmp.eq.s32.totalorder %s25_s29, 0  ;;  %p35_p2 = scmp.ne.s32.totalorder %s1135_s17, %s1131_s16 }
  0x2a   : > { %p36_p4 = scmp.eq.s32.totalorder %s1139_s18, 0  ;;  %p944_p6 = scmp.lt.s32.totalorder %s1139_s18, 2 }
  0x2b   : > { %s1266_s24 = scalar_select %p26_p1, %s1135_s17, %s28_s28  }
  0x2c   : > { %p37_p8 = por %p36_p4, %p35_p2  ;;  %p1502_p10 = scmp.eq.s32.totalorder %s1197_s19, 1 }
  0x2d   : > { %s173_s26 = sand.u32 1, %s1135_s17   ;;  %s791_s5 = sshll.u32 %s1139_s18, 8 }
  0x2e   : > { %p1270_p12 = por %p1502_p10, %p35_p2  ;;  %s768_s6 = sshll.u32 %s173_s26, 4 }
  0x2f   : > { %s1279_s9 = scalar_lea.hbm %s1490_s0, %s791_s5  ;;  %s177_s25 = scalar_lea.vmem [#allocation2], %s768_s6 }
  0x30   : > { %s184_s28 = sshll.u32 %s177_s25, 4  ;;  %p1281_p11 = pnand %p944_p6, %p37_p8  ;;  %s1285_s28 = int_to_ptr.vmem [resolvable:$true] %s184_s28 }
  0x31   : > { %s1287_s10 = scalar_lea.sflag [#allocation3], %s173_s26  ;;  %s1039_s11 = scalar_lea.hbm %s1279_s9, 256 }
  0x32   : > { %p1040_p13 = scmp.ne.s32.totalorder %s1279_s9, %s1039_s11  ;;  %p1041_p0 = pneg %p1281_p11 }
  0x33   : > { %s1044_s5 = scalar_lea.hbm %s1490_s0, 512  ;;  %p1045_p7 = scmp.lt.u32.totalorder %s1279_s9, %s1490_s0 }
  0x34   : > { %p1042_p3 = pnand %p1041_p0, %p1040_p13  ;;  %p1046_p9 = scmp.lt.u32.totalorder %s1044_s5, %s1039_s11 }
  0x35   : > { %p1048_p2 = scmp.lt.u32.totalorder %s1039_s11, %s1279_s9 }
  0x36   : > { %p1043_p5 = pneg %p1042_p3  ;;  %p1047_p1 = por %p1046_p9, %p1045_p7 }
  0x38   : > { %p1049_p4 = por %p1048_p2, %p1047_p1 }
  0x3a   : > { %p1050_p6 = pnand %p1049_p4, %p1043_p5 }
  0x3c   : > { %1053 = shalt.err (!%p1050_p6)
}
  0x3d   : > { %s1054_s26 = scalar_lea.vmem %s1285_s28, 256  ;;  %s1144_s8 = smov [#allocation2]  }
  0x3e   : > { %p1055_p8 = scmp.ne.s32.totalorder %s1285_s28, %s1054_s26  ;;  %s1059_s25 = sshll.u32 %s1144_s8, 4  ;;  %s1060_s25 = int_to_ptr.vmem [resolvable:$false] %s1059_s25 }
  0x3f   : > { %s1061_s14 = scalar_lea.vmem %s1060_s25, 512  ;;  %p1062_p3 = scmp.lt.s32.totalorder %s1285_s28, %s1060_s25 }
  0x40   : > { %p1057_p10 = pnand %p1055_p8, %p1041_p0  ;;  %p1063_p7 = scmp.lt.s32.totalorder %s1061_s14, %s1054_s26 }
  0x42   : > { %p1058_p13 = pneg %p1057_p10  ;;  %p1064_p9 = por %p1063_p7, %p1062_p3 }
  0x44   : > { %p1065_p1 = pnand %p1064_p9, %p1058_p13 }
  0x46   : > { %1068 = shalt.err (!%p1065_p1)
}
  0x47   : > { %938 = dma.hbm_to_vmem [thread:$0]  (!%p1281_p11), %s1279_s9, 256, %s1285_s28, %s1287_s10, %s1142_s12, %s1142_s12, %s1143_s13  }
  0x48   : > { %p1505_p0 = scmp.ne.s32.totalorder %s1500_s23, 0 }
  0x49   : > { %s1321_s11 = sand.u32 (!%p1505_p0), 1, %s1131_s16   ;;  %p1506_p5 = scmp.ne.s32.totalorder (!%p1505_p0), %s1498_s21, 0 }
  0x4a   : > { %196 = sbr.rel (%p1505_p0) target bundleno = 1586 (0x632), region = 36  ;;  %s772_s20 = sshll.u32 (!%p1505_p0), %s1321_s11, 4 }
  0x4b   : > { %s199_s5 = scalar_lea.sflag (!%p1505_p0), [#allocation3], %s1321_s11  ;;  %s202_s29 = scalar_lea.vmem (!%p1505_p0), [#allocation2], %s772_s20 }
  0x51   : > { %1114 = dma.done.wait (%p1506_p5), %s199_s5, 256  }
  0x52   : > { %1116 = vsyncadd (%p1506_p5), %s199_s5, 4294967040  ;;  %p1507_p11 = scmp.eq.s32.totalorder %s1197_s19, 0 }
  0x54   : > { %1118 = dma.done.wait (%p1507_p11), [#allocation6], 3072   ;;  %p1508_p2 = pmov %p1507_p11 }
  0x55   : > { %v1335_v0 = vld [vmem:[%s202_s29] sm:$0xff]  ;;  %v1337_v1 = vld [vmem:[%s202_s29 + $0x8] sm:$0xff]  ;;  %vm238_vm0 = vcmask 261120   ;;  %v266_v27 = vlaneseq  ;;  %s1145_s12 = smov 32   ;;  %s1146_s13 = smov 64   ;;  %vm349_vm5 = vcmask 523264  }
  0x56   : > { %1120 = vsyncadd (%p1508_p2), [#allocation6], 4294964224  ;;  %987 = vtanh.f32 %v1335_v0  ;;  %v352_v16 = vld [vmem:[#allocation5] sm:$0xff]  ;;  %v353_v17 = vld [vmem:[#allocation5 + $0x8] sm:$0xff]  ;;  %vm371_vm6 = vcmask 785408   ;;  %s1147_s10 = smov 96  }
  0x57   : > { %989 = vtanh.f32 %v1337_v1  ;;  %v354_v18 = vld [vmem:[#allocation5 + $0x10] sm:$0xff]  ;;  %v875_v19 = vpack.c.bf16 %v353_v17, %v352_v16  ;;  %v355_v20 = vld [vmem:[#allocation5 + $0x18] sm:$0xff]  ;;  %v356_v22 = vld [vmem:[#allocation5 + $0x20] sm:$0xff]  ;;  %v1345_v31 = vshrl.u32 %v266_v27, 7  ;;  %s792_s26 = sshll.u32 %s1197_s19, 8  ;;  %s230_s8 = scalar_lea.vmem [#allocation7], %s772_s20 }
  0x58   : > { %v879_v21 = vpack.c.bf16 %v355_v20, %v354_v18  ;;  %v357_v23 = vld [vmem:[#allocation5 + $0x28] sm:$0xff]  ;;  %v358_v33 = vld [vmem:[#allocation5 + $0x30] sm:$0xff]  ;;  %v359_v34 = vld [vmem:[#allocation5 + $0x38] sm:$0xff]  ;;  %s681_s25 = sshll.u32 %s230_s8, 4  ;;  %s1441_s29 = scalar_lea.hbm %s1494_s4, %s792_s26  ;;  %s1443_s25 = int_to_ptr.vmem [resolvable:$true] %s681_s25 }
  0x59   : > { %876 = vmatprep.subr.bf16.mxu0 %v875_v19  ;;  %v883_v24 = vpack.c.bf16 %v357_v23, %v356_v22  ;;  %v887_v35 = vpack.c.bf16 %v359_v34, %v358_v33  ;;  %v268_v36 = vsub.s32 0, %v1345_v31  ;;  %v235_v37 = vld [vmem:[%s1493_s3] sm:$0x3]  ;;  %v361_v39 = vld [vmem:[#allocation5 + $0x48] sm:$0xff]  ;;  %v274_v40 = vsub.s32 1, %v1345_v31  ;;  %v362_v44 = vld [vmem:[#allocation5 + $0x50] sm:$0xff] }
  0x5a   : > { %878 = vmatpush3.bf16.msra.mxu0 %v875_v19  ;;  %v360_v38 = vld [vmem:[#allocation5 + $0x40] sm:$0xff]  ;;  %v363_v45 = vld [vmem:[#allocation5 + $0x58] sm:$0xff]  ;;  %v280_v54 = vadd.s32 8, %v1345_v31  ;;  %vm322_vm1 = vcmp.lt.s32.totalorder %v1345_v31, 7  ;;  %v285_v63 = vand.u32 15, %v1345_v31  ;;  %vm311_vm3 = vcmp.lt.s32.totalorder %v1345_v31, 1 }
  0x5b   : > { %880 = vmatprep.subr.bf16.mxu0 %v879_v21  ;;  %v891_v41 = vpack.c.bf16 %v361_v39, %v360_v38  ;;  %v269_v42 = vrot.slane %v235_v37, %v268_v36  ;;  %v275_v47 = vrot.slane %v235_v37, %v274_v40  ;;  %v895_v48 = vpack.c.bf16 %v363_v45, %v362_v44  ;;  %v775_v16 = vld [vmem:[%s1492_s2] ss:$0 sm:$0xff]  ;;  %v525_v36 = vld [vmem:[#allocation5 + $0x68] sm:$0xff]  ;;  %v526_v37 = vld [vmem:[#allocation5 + $0x70] sm:$0xff]  ;;  %s668_s19 = scalar_lea.sflag [#allocation4], %s1321_s11  ;;  %s1069_s20 = scalar_lea.vmem %s1443_s25, 256 }
  0x5c   : > { %v292_v58 = vand.u32 15, %v280_v54  ;;  %vm1380_vm4 = vcmp.ne.s32.totalorder %v285_v63, 0  ;;  %v527_v40 = vld [vmem:[#allocation5 + $0x78] sm:$0xff]  ;;  %v530_v45 = vld [vmem:[#allocation5 + $0x90] sm:$0xff]  ;;  %v781_v31 = vld [vmem:[%s1492_s2 + $0x1] ss:$0 sm:$0xff]  ;;  %p1070_p4 = scmp.ne.s32.totalorder %s1443_s25, %s1069_s20 }
  0x5d   : > { %s1148_s21 = smov [#allocation7]  }
  0x5e   : > { %882 = vmatpush3.bf16.msra.mxu0 %v879_v21  ;;  %vm1367_vm2 = vcmp.ne.s32.totalorder %v292_v58, 15  ;;  %p1071_p6 = pnand %p1070_p4, %p1270_p12  ;;  %s1073_s23 = sshll.u32 %s1148_s21, 4  ;;  %s1074_s23 = int_to_ptr.vmem [resolvable:$false] %s1073_s23 }
  0x5f   : > { %884 = vmatprep.subr.bf16.mxu0 %v883_v24  ;;  %p1076_p10 = scmp.lt.s32.totalorder %s1443_s25, %s1074_s23 }
  0x60   : > { %v988_v2 = vpop.eup %987  ;;  %p1072_p8 = pneg %p1071_p6 }
  0x61   : > { %v990_v3 = vpop.eup %989  ;;  %v239_v4 = vsel %vm238_vm0, %v988_v2, 0.0 }
  0x62   : > { %240 = vadd.xlane.f32.xlu0 %v239_v4  ;;  %v242_v5 = vsel %vm238_vm0, %v990_v3, 0.0  ;;  %886 = vmatpush3.bf16.msra.mxu0 %v883_v24 }
  0x63   : > { %888 = vmatprep.subr.bf16.mxu0 %v887_v35 }
  0x66   : > { %243 = vadd.xlane.f32.xlu0 %v242_v5  ;;  %890 = vmatpush3.bf16.msra.mxu0 %v887_v35  ;;  %v524_v35 = vld [vmem:[#allocation5 + $0x60] sm:$0xff] }
  0x67   : > { %892 = vmatprep.subr.bf16.mxu0 %v891_v41  ;;  %v899_v39 = vpack.c.bf16 %v525_v36, %v524_v35 }
  0x69   : > { %900 = vmatprep.subr.bf16.mxu1 %v899_v39 }
  0x6a   : > { %894 = vmatpush3.bf16.msra.mxu0 %v891_v41  ;;  %v903_v41 = vpack.c.bf16 %v527_v40, %v526_v37  ;;  %902 = vmatpush3.bf16.msra.mxu1 %v899_v39 }
  0x6b   : > { %896 = vmatprep.subr.bf16.mxu0 %v895_v48 }
  0x6c   : > { %904 = vmatprep.subr.bf16.mxu1 %v903_v41 }
  0x6e   : > { %898 = vmatpush3.bf16.msra.mxu0 %v895_v48  ;;  %906 = vmatpush3.bf16.msra.mxu1 %v903_v41  ;;  %v532_v48 = vld [vmem:[#allocation5 + $0xa0] sm:$0xff] }
  0xef   : > { %v241_v6 = vpop.xlane.xlu0 %240 }
  0xf0   : > { %v246_v7 = vmul.f32 0.03125, %v241_v6 }
  0xf2   : > { %v248_v8 = vsub.f32 %v988_v2, %v246_v7 }
  0xf3   : > { %v244_v9 = vpop.xlane.xlu0 %243 }
  0xf4   : > { %v247_v10 = vmul.f32 0.03125, %v244_v9  ;;  %v250_v11 = vmul.f32 %v248_v8, %v248_v8 }
  0xf6   : > { %v249_v12 = vsub.f32 %v990_v3, %v247_v10  ;;  %v252_v13 = vsel %vm238_vm0, %v250_v11, 0.0 }
  0xf7   : > { %253 = vadd.xlane.f32.xlu1 %v252_v13 }
  0xf8   : > { %v251_v14 = vmul.f32 %v249_v12, %v249_v12 }
  0xfa   : > { %v255_v15 = vsel %vm238_vm0, %v251_v14, 0.0 }
  0xfb   : > { %256 = vadd.xlane.f32.xlu1 %v255_v15 }
 0x184   : > { %v254_v25 = vpop.xlane.xlu1 %253 }
 0x185   : > { %v258_v26 = vmul.f32 0.03125, %v254_v25 }
 0x187   : > { %v260_v28 = vadd.f32 1e-05, %v258_v26 }
 0x188   : > { %v257_v29 = vpop.xlane.xlu1 %256 }
 0x189   : > { %991 = vrsqrt.f32 %v260_v28  ;;  %v259_v30 = vmul.f32 0.03125, %v257_v29 }
 0x18b   : > { %v261_v32 = vadd.f32 1e-05, %v259_v30 }
 0x18d   : > { %993 = vrsqrt.f32 %v261_v32 }
 0x193   : > { %v992_v43 = vpop.eup %991 }
 0x194   : > { %v264_v46 = vmul.f32 %v992_v43, %v248_v8  ;;  %v529_v43 = vld [vmem:[#allocation5 + $0x88] sm:$0xff] }
 0x196   : > { %v270_v49 = vmul.f32 %v269_v42, %v264_v46  ;;  %v531_v46 = vld [vmem:[#allocation5 + $0x98] sm:$0xff] }
 0x197   : > { %v994_v50 = vpop.eup %993 }
 0x198   : > { %v1352_v51 = vadd.f32 %v275_v47, %v270_v49  ;;  %v265_v52 = vmul.f32 %v994_v50, %v249_v12  ;;  %v533_v49 = vld [vmem:[#allocation5 + $0xa8] sm:$0xff] }
 0x199   : > { %v915_v50 = vpack.c.bf16 %v533_v49, %v532_v48 }
 0x19a   : > { %333 = vrot.lane.b32.xlu0 %v1352_v51, %s1145_s12  ;;  %v271_v53 = vmul.f32 %v269_v42, %v265_v52  ;;  %v320_v56 = vrot.slane %v1352_v51, 1  ;;  %v309_v3 = vrot.slane %v1352_v51, 7  ;;  %v528_v42 = vld [vmem:[#allocation5 + $0x80] sm:$0xff]  ;;  %v534_v52 = vld [vmem:[#allocation5 + $0xb0] sm:$0xff] }
 0x19b   : > { %v907_v44 = vpack.c.bf16 %v529_v43, %v528_v42 }
 0x19c   : > { %v1357_v55 = vadd.f32 %v275_v47, %v271_v53  ;;  %v911_v47 = vpack.c.bf16 %v531_v46, %v530_v45  ;;  %v535_v53 = vld [vmem:[#allocation5 + $0xb8] sm:$0xff] }
 0x19d   : > { %908 = vmatprep.subr.bf16.mxu1 %v907_v44  ;;  %v919_v54 = vpack.c.bf16 %v535_v53, %v534_v52 }
 0x19e   : > { %335 = vrot.lane.b32.xlu1 %v1357_v55, %s1145_s12  ;;  %v321_v57 = vrot.slane %v1357_v55, 1  ;;  %v310_v2 = vrot.slane %v1357_v55, 7  ;;  %910 = vmatpush3.bf16.msra.mxu1 %v907_v44 }
 0x19f   : > { %912 = vmatprep.subr.bf16.mxu1 %v911_v47 }
 0x1a0   : > { %v323_v59 = vsel %vm322_vm1, %v320_v56, %v321_v57  ;;  %v324_v61 = vsel %vm322_vm1, %v321_v57, %v320_v56  ;;  %v313_v5 = vsel %vm311_vm3, %v310_v2, %v309_v3  ;;  %v312_v12 = vsel %vm311_vm3, %v309_v3, %v310_v2 }
 0x1a1   : > { %v330_v62 = vsel %vm1367_vm2, %v324_v61, 0.0  ;;  %v318_v8 = vsel %vm1380_vm4, %v313_v5, 0.0 }
 0x1a2   : > { %341 = vrot.lane.b32.xlu1 %v323_v59, %s1146_s13  ;;  %914 = vmatpush3.bf16.msra.mxu1 %v911_v47 }
 0x1a3   : > { %916 = vmatprep.subr.bf16.mxu1 %v915_v50 }
 0x1a6   : > { %343 = vrot.lane.b32.xlu1 %v330_v62, %s1146_s13  ;;  %918 = vmatpush3.bf16.msra.mxu1 %v915_v50 }
 0x1a7   : > { %920 = vmatprep.subr.bf16.mxu1 %v919_v54 }
 0x1aa   : > { %922 = vmatpush3.bf16.msra.mxu1 %v919_v54 }
 0x20c   : > { %v334_v7 = vpop.permute.xlu0 %333 }
 0x20d   : > { %v347_v9 = vsel %vm238_vm0, %v318_v8, %v334_v7 }
 0x210   : > { %v336_v6 = vpop.permute.xlu1 %335 }
 0x211   : > { %v348_v13 = vsel %vm238_vm0, %v312_v12, %v336_v6 }
 0x214   : > { %v342_v10 = vpop.permute.xlu1 %341 }
 0x215   : > { %v350_v11 = vsel %vm349_vm5, %v347_v9, %v342_v10 }
 0x216   : > { %845 = vmatprep.mubr.msk.f32.mxu0 %vm371_vm6, %v350_v11 }
 0x218   : > { %v344_v14 = vpop.permute.xlu1 %343 }
 0x219   : > { %v351_v15 = vsel %vm349_vm5, %v348_v13, %v344_v14 }
 0x21a   : > { %846 = vmatmul.mubr.msk.f32.vlgmr.msra.gmra.mrb[0].mxu0 %vm371_vm6, %v351_v15 }
 0x2ed   : > { %v847_v17 = vpop.f32.mrb[0].mxu0 }
 0x2ee   : > { %v450_v18 = vadd.f32 %v847_v17, %v775_v16  ;;  %v444_v19 = vpop.f32.mrb[1].mxu0 }
 0x2ef   : > { %v445_v20 = vadd.f32 %v775_v16, %v444_v19 }
 0x2f0   : > { %v466_v21 = vmax.f32 %v450_v18, 0.0  ;;  %v779_v23 = vmul.f32 -1.442695, %v450_v18 }
 0x2f1   : > { %v465_v22 = vmax.f32 %v445_v20, 0.0  ;;  %v778_v24 = vmul.f32 -1.442695, %v445_v20 }
 0x2f2   : > { %471 = vrot.lane.b32.xlu1 %v466_v21, %s1146_s13  ;;  %995 = vpow2.f32 %v779_v23 }
 0x2f3   : > { %469 = vrot.lane.b32.xlu0 %v465_v22, %s1146_s13  ;;  %997 = vpow2.f32 %v778_v24 }
 0x2fc   : > { %v996_v25 = vpop.eup %995 }
 0x2fd   : > { %v998_v26 = vpop.eup %997  ;;  %v460_v27 = vadd.f32 1.0, %v996_v25 }
 0x2fe   : > { %v459_v28 = vadd.f32 1.0, %v998_v26 }
 0x2ff   : > { %999 = vrcp.f32 %v460_v27 }
 0x300   : > { %1001 = vrcp.f32 %v459_v28 }
 0x309   : > { %v1000_v29 = vpop.eup %999 }
 0x30a   : > { %v1002_v32 = vpop.eup %1001 }
 0x364   : > { %v472_v30 = vpop.permute.xlu1 %471 }
 0x365   : > { %v476_v33 = vmul.f32 %v1000_v29, %v472_v30  ;;  %v470_v34 = vpop.permute.xlu0 %469 }
 0x366   : > { %v475_v38 = vmul.f32 %v1002_v32, %v470_v34 }
 0x367   : > { %481 = vrot.lane.b32.xlu1 %v476_v33, %s1147_s10 }
 0x368   : > { %479 = vrot.lane.b32.xlu0 %v475_v38, %s1147_s10 }
 0x3d9   : > { %v482_v56 = vpop.permute.xlu1 %481 }
 0x3da   : > { %v486_v57 = vmul.f32 %v482_v56, %v476_v33  ;;  %v480_v58 = vpop.permute.xlu0 %479 }
 0x3db   : > { %v485_v59 = vmul.f32 %v480_v58, %v475_v38 }
 0x3dc   : > { %v488_v61 = vmul.f32 %v486_v57, %v1357_v55 }
 0x3dd   : > { %v487_v62 = vmul.f32 %v485_v59, %v1352_v51 }
 0x3de   : > { %v490_v63 = vmax.f32 %v488_v61, 0.0 }
 0x3df   : > { %v489_v2 = vmax.f32 %v487_v62, 0.0 }
 0x3e0   : > { %507 = vrot.lane.b32.xlu1 %v490_v63, %s1145_s12  ;;  %v498_v3 = vrot.slane %v490_v63, 1  ;;  %v492_v55 = vrot.slane %v490_v63, 7 }
 0x3e1   : > { %505 = vrot.lane.b32.xlu0 %v489_v2, %s1145_s12  ;;  %v497_v5 = vrot.slane %v489_v2, 1  ;;  %v491_v51 = vrot.slane %v489_v2, 7  ;;  %s1075_s12 = scalar_lea.vmem %s1074_s23, 512 }
 0x3e2   : > { %p1077_p13 = scmp.lt.s32.totalorder %s1075_s12, %s1069_s20 }
 0x3e3   : > { %v500_v6 = vsel %vm322_vm1, %v498_v3, %v497_v5  ;;  %v499_v7 = vsel %vm322_vm1, %v497_v5, %v498_v3  ;;  %v494_v11 = vsel %vm311_vm3, %v492_v55, %v491_v51  ;;  %v493_v12 = vsel %vm311_vm3, %v491_v51, %v492_v55 }
 0x3e4   : > { %v502_v8 = vsel %vm1367_vm2, %v500_v6, 0.0  ;;  %v495_v13 = vsel %vm1380_vm4, %v494_v11, 0.0  ;;  %p1078_p3 = por %p1077_p13, %p1076_p10 }
 0x3e5   : > { %515 = vrot.lane.b32.xlu1 %v502_v8, %s1146_s13  ;;  %513 = vrot.lane.b32.xlu0 %v499_v7, %s1146_s13 }
 0x3e6   : > { %p1079_p7 = pnand %p1078_p3, %p1072_p8 }
 0x452   : > { %v508_v9 = vpop.permute.xlu1 %507 }
 0x453   : > { %v506_v10 = vpop.permute.xlu0 %505  ;;  %v520_v60 = vsel %vm238_vm0, %v493_v12, %v508_v9 }
 0x454   : > { %v519_v14 = vsel %vm238_vm0, %v495_v13, %v506_v10 }
 0x457   : > { %v516_v15 = vpop.permute.xlu1 %515  ;;  %v514_v16 = vpop.permute.xlu0 %513 }
 0x458   : > { %v522_v17 = vsel %vm349_vm5, %v520_v60, %v516_v15  ;;  %v521_v18 = vsel %vm349_vm5, %v519_v14, %v514_v16 }
 0x459   : > { %872 = vmatprep.mubr.msk.f32.mxu1 %vm371_vm6, %v521_v18 }
 0x45a   : > { %873 = vmatmul.mubr.msk.f32.vlgmr.msra.gmra.mrb[0].mxu1 %vm371_vm6, %v522_v17 }
 0x52d   : > { %v874_v4 = vpop.f32.mrb[0].mxu1 }
 0x52e   : > { %v622_v19 = vadd.f32 %v874_v4, %v781_v31  ;;  %v616_v20 = vpop.f32.mrb[1].mxu1 }
 0x52f   : > { %v617_v21 = vadd.f32 %v781_v31, %v616_v20 }
 0x530   : > { %v638_v22 = vmax.f32 %v622_v19, 0.0  ;;  %v785_v24 = vmul.f32 -1.442695, %v622_v19 }
 0x531   : > { %v637_v23 = vmax.f32 %v617_v21, 0.0  ;;  %v784_v25 = vmul.f32 -1.442695, %v617_v21 }
 0x532   : > { %643 = vrot.lane.b32.xlu1 %v638_v22, %s1146_s13  ;;  %1003 = vpow2.f32 %v785_v24 }
 0x533   : > { %641 = vrot.lane.b32.xlu0 %v637_v23, %s1146_s13  ;;  %1005 = vpow2.f32 %v784_v25 }
 0x53c   : > { %v1004_v26 = vpop.eup %1003 }
 0x53d   : > { %v1006_v27 = vpop.eup %1005  ;;  %v632_v28 = vadd.f32 1.0, %v1004_v26 }
 0x53e   : > { %v631_v29 = vadd.f32 1.0, %v1006_v27 }
 0x53f   : > { %1007 = vrcp.f32 %v632_v28 }
 0x540   : > { %1009 = vrcp.f32 %v631_v29 }
 0x549   : > { %v1008_v30 = vpop.eup %1007 }
 0x54a   : > { %v1010_v33 = vpop.eup %1009 }
 0x5a4   : > { %v644_v32 = vpop.permute.xlu1 %643 }
 0x5a5   : > { %v648_v34 = vmul.f32 %v1008_v30, %v644_v32  ;;  %v642_v35 = vpop.permute.xlu0 %641 }
 0x5a6   : > { %v647_v36 = vmul.f32 %v1010_v33, %v642_v35 }
 0x5a7   : > { %653 = vrot.lane.b32.xlu1 %v648_v34, %s1147_s10 }
 0x5a8   : > { %651 = vrot.lane.b32.xlu0 %v647_v36, %s1147_s10 }
 0x619   : > { %v654_v37 = vpop.permute.xlu1 %653 }
 0x61a   : > { %v658_v38 = vmul.f32 %v654_v37, %v648_v34  ;;  %v652_v39 = vpop.permute.xlu0 %651 }
 0x61b   : > { %v657_v40 = vmul.f32 %v652_v39, %v647_v36 }
 0x61c   : > { %v660_v41 = vadd.f32 %v658_v38, %v490_v63 }
 0x61d   : > { %v659_v42 = vadd.f32 %v657_v40, %v489_v2 }
 0x61e   : > { %v662_v43 = vmax.f32 %v660_v41, 0.0 }
 0x61f   : > { %v661_v44 = vmax.f32 %v659_v42, 0.0 }
 0x620   : > { %v664_v45 = vadd.f32 %v662_v43, %v1337_v1 }
 0x621   : > { %v663_v46 = vadd.f32 %v661_v44, %v1335_v0 }
 0x622   : > { %666 = vst.msk [vmem:[%s230_s8 + $0x8] sm:$0xff] %vm238_vm0, %v664_v45 }
 0x623   : > { %665 = vst.msk [vmem:[%s230_s8] sm:$0xff] %vm238_vm0, %v663_v46 }
 0x624   : > { %1082 = shalt.err (!%p1079_p7)
}
 0x625   : > { %s1083_s13 = scalar_lea.hbm %s1441_s29, 256  ;;  %s1087_s10 = scalar_lea.hbm %s1494_s4, 512 }
 0x626   : > { %p1084_p9 = scmp.ne.s32.totalorder %s1441_s29, %s1083_s13  ;;  %p1088_p5 = scmp.lt.u32.totalorder %s1441_s29, %s1494_s4 }
 0x627   : > { %p1089_p11 = scmp.lt.u32.totalorder %s1087_s10, %s1083_s13  ;;  %p1091_p4 = scmp.lt.u32.totalorder %s1083_s13, %s1441_s29 }
 0x628   : > { %p1085_p1 = pnand %p1084_p9, %p1270_p12 }
 0x629   : > { %p1090_p2 = por %p1089_p11, %p1088_p5 }
 0x62a   : > { %p1086_p0 = pneg %p1085_p1 }
 0x62b   : > { %p1092_p6 = por %p1091_p4, %p1090_p2 }
 0x62d   : > { %p1093_p8 = pnand %p1092_p6, %p1086_p0 }
 0x62f   : > { %1096 = shalt.err (!%p1093_p8)
}
 0x630   : > { %s1149_s26 = smov 128   ;;  %s1150_s8 = smov 8  }
 0x631   : > { %929 = dma.vmem_to_hbm [thread:$0]  (%p1270_p12), %s1443_s25, 256, %s1441_s29, %s668_s19, %s1149_s26, %s1149_s26, %s1150_s8  }
 0x632 PF: > { %s696_s14 = sand.u32 1, %s1127_s15   ;;  %p1513_p10 = scmp.ne.s32.totalorder %s1499_s22, 0 }
 0x633   : > { %p1514_p13 = scmp.ge.s32.totalorder %s1139_s18, 2  ;;  %s697_s5 = scalar_lea.sflag [#allocation4], %s696_s14 }
 0x635   : > { %p940_p3 = pnand %p1514_p13, %p1513_p10 }
 0x637   : > { %1122 = dma.done.wait (!%p940_p3), %s697_s5, 256  }
 0x638   : > { %1124 = vsyncadd (!%p940_p3), %s697_s5, 4294967040  ;;  %p18_p7 = scmp.ge.s32.totalorder %s1232_s27, 4   ;;  %s1515_s15 = smov %s1131_s16 }
 0x639   : > { %s1516_s16 = smov %s1135_s17  ;;  %s1517_s17 = smov %s1266_s24 }
 0x63a   : > { %s1518_s18 = smov %s1232_s27  ;;  %20 = sbr.rel (!%p18_p7) target bundleno = 6 (0x6), region = 87 }
 0x641   :  { %702 = vsyncpa [#allocation3], 1 }
 0x642   :  { %704 = vsyncpa [#allocation3 + $0x1], 1 }
 0x643   :  { %705 = vsyncpa [#allocation6], 1 }
 0x644   :  { %706 = vsyncpa [#allocation4], 1 }
 0x645   :  { %708 = vsyncpa [#allocation4 + $0x1], 1 }

</bundles_post_ra>
